<compile_context>
chip_gen: v7x
topology: tpu7x:2x2x1
jax: 0.10.0
libtpu: 0.0.40
codegen_flags: <defaults>
</compile_context>

<pallas_src>
import jax
import jax.numpy as jnp
import numpy as np
from jax.experimental import pallas as pl
from jax.experimental.pallas import tpu as pltpu


def _round_up(v, m):
    return (v + m - 1) // m * m


def _vmem_limit_bytes():
    # Leave headroom for Mosaic internal scratch; never request all of VMEM.
    try:
        cap = pltpu.get_tpu_info().vmem_capacity_bytes
        return int(min(cap - 16 * 1024 * 1024, 100 * 1024 * 1024))
    except Exception:
        return 48 * 1024 * 1024  # safe on every generation (incl. v7x 64 MiB)


def _make_bbb_kernel(collect_samples):
    def kernel(x_ref, mu_w_ref, std_w_ref, mu_b_ref, std_b_ref,
               eps_w_ref, eps_b_ref, *refs):
        if collect_samples:
            y_ref, w_out_ref, b_out_ref, acc_ref = refs
        else:
            y_ref, acc_ref = refs

        k = pl.program_id(2)  # K (reduction) tile index, innermost

        @pl.when(k == 0)
        def _():
            acc_ref[...] = jnp.zeros_like(acc_ref)

        # Reparameterisation in f32 (bf16 storage, f32 math): keeps the
        # std*eps noise from being rounded away and is v5e-safe (no bf16 VPU).
        w = (mu_w_ref[...].astype(jnp.float32)
             + std_w_ref[...].astype(jnp.float32)
             * eps_w_ref[...].astype(jnp.float32))                      # (tk, tn)

        # f32 matmul: the MXU is nearly idle at these batch sizes, so the
        # extra passes are free and preserve the noise contribution exactly.
        acc_ref[...] += jnp.dot(x_ref[...].astype(jnp.float32), w,
                                preferred_element_type=jnp.float32)     # (B, tn)

        if collect_samples:
            # Mirrors the module's sampled_w buffer (verification / KL path).
            w_out_ref[...] = w.astype(w_out_ref.dtype)

        @pl.when(k == pl.num_programs(2) - 1)
        def _():
            b = mu_b_ref[...] + std_b_ref[...] * eps_b_ref[...]         # (1, tn)
            y_ref[...] = (acc_ref[...] + b).astype(y_ref.dtype)
            if collect_samples:
                b_out_ref[...] = b.astype(b_out_ref.dtype)

    return kernel


def bbb_forward(x, mu_w, rho_w, mu_b, rho_b, key, *,
                return_samples=False, samples_dtype=jnp.bfloat16,
                weights_dtype=jnp.bfloat16, tile_n=512, tile_k=512):
    """BBBLayer forward.  Returns y (S, B, N); with return_samples=True also
    returns the sampled weights (S, K, N) and biases (S, N)."""
    S, B, K = x.shape
    Kw, N = mu_w.shape
    assert Kw == K and mu_b.shape == (N,) and rho_b.shape == (N,)

    # Grid-invariant, numerically stable softplus computed once (hoist this
    # plus the weight padding/casting out of the call when weights are reused).
    std_w = jax.nn.softplus(rho_w)
    std_b = jax.nn.softplus(rho_b)

    # Per-weight Gaussian noise (torch.randn per sample in the module), drawn
    # at the LOGICAL shape so the random stream does not depend on tiling.
    kw, kb = jax.random.split(key)
    eps_w = jax.random.normal(kw, (S, K, N), jnp.float32)
    eps_b = jax.random.normal(kb, (S, N), jnp.float32)

    # Lane/sublane-friendly tile sizes (zero padding is exactly neutral for a
    # linear layer and is sliced off afterwards).
    tk = min(_round_up(tile_k, 128), _round_up(K, 128))
    tn = min(_round_up(tile_n, 128), _round_up(N, 128))
    k_pad = _round_up(K, tk)
    n_pad = _round_up(N, tn)
    k_tiles = k_pad // tk
    n_tiles = n_pad // tn

    # bf16 in HBM halves activation / weight / noise DMA traffic and VMEM.
    xp = jnp.pad(x, ((0, 0), (0, 0), (0, k_pad - K))).astype(jnp.bfloat16)
    mu_w_p = jnp.pad(mu_w, ((0, k_pad - K), (0, n_pad - N))).astype(weights_dtype)
    std_w_p = jnp.pad(std_w, ((0, k_pad - K), (0, n_pad - N))).astype(weights_dtype)
    mu_b_p = jnp.pad(mu_b, (0, n_pad - N)).reshape(1, n_pad)
    std_b_p = jnp.pad(std_b, (0, n_pad - N)).reshape(1, n_pad)
    eps_w_p = jnp.pad(eps_w, ((0, 0), (0, k_pad - K), (0, n_pad - N))
                      ).astype(jnp.bfloat16)
    eps_b_p = jnp.pad(eps_b, ((0, 0), (0, n_pad - N))).reshape(S, 1, n_pad)

    out_shapes = [jax.ShapeDtypeStruct((S, B, n_pad), jnp.float32)]
    out_specs = [pl.BlockSpec((pl.Squeezed(), B, tn),
                              lambda j, s, k: (s, 0, j))]
    if return_samples:
        out_shapes += [
            jax.ShapeDtypeStruct((S, k_pad, n_pad), samples_dtype),
            jax.ShapeDtypeStruct((S, 1, n_pad), jnp.float32),
        ]
        out_specs += [
            pl.BlockSpec((pl.Squeezed(), tk, tn), lambda j, s, k: (s, k, j)),
            pl.BlockSpec((pl.Squeezed(), 1, tn), lambda j, s, k: (s, 0, j)),
        ]

    results = pl.pallas_call(
        _make_bbb_kernel(return_samples),
        out_shape=out_shapes,
        grid_spec=pltpu.PrefetchScalarGridSpec(
            num_scalar_prefetch=0,
            # N-tiles outermost ("parallel": megacore split stays on N so each
            # weight tile lives on one core), samples in the middle, K
            # (reduction) innermost feeding the f32 accumulator.
            grid=(n_tiles, S, k_tiles),
            in_specs=[
                pl.BlockSpec((pl.Squeezed(), B, tk),
                             lambda j, s, k: (s, 0, k)),                 # x[s]
                pl.BlockSpec((tk, tn), lambda j, s, k: (k, j)),          # mu_w
                pl.BlockSpec((tk, tn), lambda j, s, k: (k, j)),          # std_w
                pl.BlockSpec((1, tn), lambda j, s, k: (0, j)),           # mu_b
                pl.BlockSpec((1, tn), lambda j, s, k: (0, j)),           # std_b
                pl.BlockSpec((pl.Squeezed(), tk, tn),
                             lambda j, s, k: (s, k, j)),                 # eps_w
                pl.BlockSpec((pl.Squeezed(), 1, tn),
                             lambda j, s, k: (s, 0, j)),                 # eps_b
            ],
            out_specs=out_specs,
            scratch_shapes=[pltpu.VMEM((B, tn), jnp.float32)],           # acc
        ),
        compiler_params=pltpu.CompilerParams(
            dimension_semantics=("parallel", "arbitrary", "arbitrary"),
            vmem_limit_bytes=_vmem_limit_bytes(),
        ),
    )(xp, mu_w_p, std_w_p, mu_b_p, std_b_p, eps_w_p, eps_b_p)

    y = results[0][:, :, :N]
    if return_samples:
        w_s = results[1][:, :K, :N]
        b_s = results[2][:, 0, :N]
        return y, w_s, b_s
    return y


if __name__ == "__main__":
    # Small, module-consistent config.
    n_weight_samples, batch = 2, 8          # S, B
    n_inputs, n_outputs = 128, 256          # K, N
    init_mean, init_std = 0.0, 1.0

    root = jax.random.PRNGKey(0)
    k_mu_w, k_rho_w, k_mu_b, k_rho_b, k_x, k_noise = jax.random.split(root, 6)
    mu_w = jax.random.normal(k_mu_w, (n_inputs, n_outputs), jnp.float32) * init_std + init_mean
    rho_w = jax.random.normal(k_rho_w, (n_inputs, n_outputs), jnp.float32) * init_std + init_mean
    mu_b = jax.random.normal(k_mu_b, (n_outputs,), jnp.float32) * init_std + init_mean
    rho_b = jax.random.normal(k_rho_b, (n_outputs,), jnp.float32) * init_std + init_mean
    x = jax.random.normal(k_x, (n_weight_samples, batch, n_inputs), jnp.float32)

    # Verification path: also emit the sampled w/b (like the module's sampled_w
    # / sampled_b buffers, here in f32 for an exact cross-check).
    y_chk, w_s, b_s = jax.block_until_ready(
        bbb_forward(x, mu_w, rho_w, mu_b, rho_b, k_noise,
                    return_samples=True, samples_dtype=jnp.float32))
    assert y_chk.shape == (n_weight_samples, batch, n_outputs)

    x_bf = x.astype(jnp.bfloat16).astype(jnp.float32)
    y_ref = jnp.einsum("sbk,skn->sbn", x_bf, w_s,
                       preferred_element_type=jnp.float32) + b_s[:, None, :]
    assert np.allclose(np.asarray(y_chk), np.asarray(y_ref), rtol=2e-2, atol=2e-2)

    # Implied epsilon = (w - mu) / softplus(rho) should be ~N(0, 1)
    # (using the bf16-stored mu/std the kernel actually consumed).
    mu_bf = np.asarray(mu_w.astype(jnp.bfloat16).astype(jnp.float32))
    std_bf = np.asarray(jax.nn.softplus(rho_w).astype(jnp.bfloat16).astype(jnp.float32))
    eps_implied = (np.asarray(w_s) - mu_bf[None]) / std_bf[None]
    assert abs(float(eps_implied.mean())) < 0.1
    assert 0.85 < float(eps_implied.std()) < 1.15

    # Production path: no sample write-back -> no S*K*N output stream at all.
    y = jax.block_until_ready(bbb_forward(x, mu_w, rho_w, mu_b, rho_b, k_noise))
    assert y.shape == (n_weight_samples, batch, n_outputs)
    assert np.all(np.isfinite(np.asarray(y)))
    assert np.allclose(np.asarray(y), np.asarray(y_chk), rtol=1e-4, atol=1e-4)

    # Unaligned shapes exercise the zero-padding path.
    K2, N2 = 16, 32
    k1, k2, k3, k4, k5, k6 = jax.random.split(jax.random.PRNGKey(1), 6)
    mu_w2 = jax.random.normal(k1, (K2, N2), jnp.float32)
    rho_w2 = jax.random.normal(k2, (K2, N2), jnp.float32)
    mu_b2 = jax.random.normal(k3, (N2,), jnp.float32)
    rho_b2 = jax.random.normal(k4, (N2,), jnp.float32)
    x2 = jax.random.normal(k5, (n_weight_samples, batch, K2), jnp.float32)
    y2, w_s2, b_s2 = jax.block_until_ready(
        bbb_forward(x2, mu_w2, rho_w2, mu_b2, rho_b2, k6,
                    return_samples=True, samples_dtype=jnp.float32))
    x2_bf = x2.astype(jnp.bfloat16).astype(jnp.float32)
    y2_ref = jnp.einsum("sbk,skn->sbn", x2_bf, w_s2,
                        preferred_element_type=jnp.float32) + b_s2[:, None, :]
    assert y2.shape == (n_weight_samples, batch, N2)
    assert np.allclose(np.asarray(y2), np.asarray(y2_ref), rtol=2e-2, atol=2e-2)

    print("KERNEL_OK")
</pallas_src>

<mosaic_0001>
module attributes {stable_mosaic.version = 11 : i64} {
  func.func @kernel(%arg0: i32, %arg1: i32, %arg2: i32, %arg3: memref<1x8x128xbf16, #tpu.memory_space<vmem>>, %arg4: memref<128x256xbf16, #tpu.memory_space<vmem>>, %arg5: memref<128x256xbf16, #tpu.memory_space<vmem>>, %arg6: memref<1x256xf32, #tpu.memory_space<vmem>>, %arg7: memref<1x256xf32, #tpu.memory_space<vmem>>, %arg8: memref<1x128x256xbf16, #tpu.memory_space<vmem>>, %arg9: memref<1x1x256xf32, #tpu.memory_space<vmem>>, %arg10: memref<1x8x256xf32, #tpu.memory_space<vmem>>, %arg11: memref<1x128x256xf32, #tpu.memory_space<vmem>>, %arg12: memref<1x1x256xf32, #tpu.memory_space<vmem>>, %arg13: memref<8x256xf32, #tpu.memory_space<vmem>>) attributes {dimension_semantics = [#tpu.dimension_semantics<parallel>, #tpu.dimension_semantics<arbitrary>, #tpu.dimension_semantics<arbitrary>], iteration_bounds = array<i64: 1, 2, 1>, scalar_prefetch = 0 : i64, scratch_operands = 1 : i64, tpu.core_type = #tpu.core_type<tc>, window_params = [{transform_indices = @transform_0, window_bounds = array<i64: 1, 8, 128>}, {transform_indices = @transform_1, window_bounds = array<i64: 128, 256>}, {transform_indices = @transform_2, window_bounds = array<i64: 128, 256>}, {transform_indices = @transform_3, window_bounds = array<i64: 1, 256>}, {transform_indices = @transform_4, window_bounds = array<i64: 1, 256>}, {transform_indices = @transform_5, window_bounds = array<i64: 1, 128, 256>}, {transform_indices = @transform_6, window_bounds = array<i64: 1, 1, 256>}, {transform_indices = @transform_7, window_bounds = array<i64: 1, 8, 256>}, {transform_indices = @transform_8, window_bounds = array<i64: 1, 128, 256>}, {transform_indices = @transform_9, window_bounds = array<i64: 1, 1, 256>}]} {
    %c0_i32 = arith.constant 0 : i32
    %0 = arith.cmpi eq, %arg2, %c0_i32 : i32
    %1 = arith.extui %0 : i1 to i32
    %c0_i32_0 = arith.constant 0 : i32
    %2 = arith.cmpi ne, %1, %c0_i32_0 : i32
    scf.if %2 {
      %cst_19 = arith.constant 0.000000e+00 : f32
      %25 = vector.broadcast %cst_19 : f32 to vector<8x256xf32>
      %c0_20 = arith.constant 0 : index
      %c0_21 = arith.constant 0 : index
      %26 = vector.load %arg13[%c0_20, %c0_21] : memref<8x256xf32, #tpu.memory_space<vmem>>, vector<8x256xf32>
      tpu.vector_store %arg13[%c0_20, %c0_21], %25 {strides = array<i32>} : memref<8x256xf32, #tpu.memory_space<vmem>>, vector<8x256xf32>,
    } else {
    }
    %c0 = arith.constant 0 : index
    %c0_1 = arith.constant 0 : index
    %3 = vector.load %arg4[%c0, %c0_1] : memref<128x256xbf16, #tpu.memory_space<vmem>>, vector<128x256xbf16>
    %4 = arith.extf %3 : vector<128x256xbf16> to vector<128x256xf32>
    %c0_2 = arith.constant 0 : index
    %c0_3 = arith.constant 0 : index
    %5 = vector.load %arg5[%c0_2, %c0_3] : memref<128x256xbf16, #tpu.memory_space<vmem>>, vector<128x256xbf16>
    %6 = arith.extf %5 : vector<128x256xbf16> to vector<128x256xf32>
    %c0_4 = arith.constant 0 : index
    %c0_5 = arith.constant 0 : index
    %c0_6 = arith.constant 0 : index
    %7 = vector.load %arg8[%c0_4, %c0_5, %c0_6] : memref<1x128x256xbf16, #tpu.memory_space<vmem>>, vector<1x128x256xbf16>
    %8 = vector.shape_cast %7 : vector<1x128x256xbf16> to vector<128x256xbf16>
    %9 = arith.extf %8 : vector<128x256xbf16> to vector<128x256xf32>
    %10 = arith.mulf %6, %9 : vector<128x256xf32>
    %11 = arith.addf %4, %10 : vector<128x256xf32>
    %c0_7 = arith.constant 0 : index
    %c0_8 = arith.constant 0 : index
    %12 = vector.load %arg13[%c0_7, %c0_8] : memref<8x256xf32, #tpu.memory_space<vmem>>, vector<8x256xf32>
    %c0_9 = arith.constant 0 : index
    %c0_10 = arith.constant 0 : index
    %c0_11 = arith.constant 0 : index
    %13 = vector.load %arg3[%c0_9, %c0_10, %c0_11] : memref<1x8x128xbf16, #tpu.memory_space<vmem>>, vector<1x8x128xbf16>
    %14 = vector.shape_cast %13 : vector<1x8x128xbf16> to vector<8x128xbf16>
    %15 = arith.extf %14 : vector<8x128xbf16> to vector<8x128xf32>
    %cst = arith.constant dense<0.000000e+00> : vector<8x256xf32>
    %16 = tpu.matmul %15, %11, %cst {dimension_numbers = #tpu.dot_dimension_numbers<[1], [0], [0], [1], [0, 0, 1, 1], [], []>} : vector<8x128xf32>, vector<128x256xf32>, vector<8x256xf32> -> vector<8x256xf32>
    %17 = arith.addf %12, %16 : vector<8x256xf32>
    %c0_12 = arith.constant 0 : index
    %c0_13 = arith.constant 0 : index
    %18 = vector.load %arg13[%c0_12, %c0_13] : memref<8x256xf32, #tpu.memory_space<vmem>>, vector<8x256xf32>
    tpu.vector_store %arg13[%c0_12, %c0_13], %17 {strides = array<i32>} : memref<8x256xf32, #tpu.memory_space<vmem>>, vector<8x256xf32>,
    %c0_14 = arith.constant 0 : index
    %c0_15 = arith.constant 0 : index
    %c0_16 = arith.constant 0 : index
    %19 = vector.load %arg11[%c0_14, %c0_15, %c0_16] : memref<1x128x256xf32, #tpu.memory_space<vmem>>, vector<1x128x256xf32>
    %20 = vector.shape_cast %19 : vector<1x128x256xf32> to vector<128x256xf32>
    %21 = vector.shape_cast %11 : vector<128x256xf32> to vector<1x128x256xf32>
    tpu.vector_store %arg11[%c0_14, %c0_15, %c0_16], %21 {strides = array<i32>} : memref<1x128x256xf32, #tpu.memory_space<vmem>>, vector<1x128x256xf32>,
    %c0_i32_17 = arith.constant 0 : i32
    %22 = arith.cmpi eq, %arg2, %c0_i32_17 : i32
    %23 = arith.extui %22 : i1 to i32
    %c0_i32_18 = arith.constant 0 : i32
    %24 = arith.cmpi ne, %23, %c0_i32_18 : i32
    scf.if %24 {
      %c0_19 = arith.constant 0 : index
      %c0_20 = arith.constant 0 : index
      %25 = vector.load %arg6[%c0_19, %c0_20] : memref<1x256xf32, #tpu.memory_space<vmem>>, vector<1x256xf32>
      %c0_21 = arith.constant 0 : index
      %c0_22 = arith.constant 0 : index
      %26 = vector.load %arg7[%c0_21, %c0_22] : memref<1x256xf32, #tpu.memory_space<vmem>>, vector<1x256xf32>
      %c0_23 = arith.constant 0 : index
      %c0_24 = arith.constant 0 : index
      %c0_25 = arith.constant 0 : index
      %27 = vector.load %arg9[%c0_23, %c0_24, %c0_25] : memref<1x1x256xf32, #tpu.memory_space<vmem>>, vector<1x1x256xf32>
      %28 = vector.shape_cast %27 : vector<1x1x256xf32> to vector<1x256xf32>
      %29 = arith.mulf %26, %28 : vector<1x256xf32>
      %30 = arith.addf %25, %29 : vector<1x256xf32>
      %c0_26 = arith.constant 0 : index
      %c0_27 = arith.constant 0 : index
      %31 = vector.load %arg13[%c0_26, %c0_27] : memref<8x256xf32, #tpu.memory_space<vmem>>, vector<8x256xf32>
      %32 = vector.broadcast %30 : vector<1x256xf32> to vector<8x256xf32>
      %33 = arith.addf %31, %32 : vector<8x256xf32>
      %c0_28 = arith.constant 0 : index
      %c0_29 = arith.constant 0 : index
      %c0_30 = arith.constant 0 : index
      %34 = vector.load %arg10[%c0_28, %c0_29, %c0_30] : memref<1x8x256xf32, #tpu.memory_space<vmem>>, vector<1x8x256xf32>
      %35 = vector.shape_cast %34 : vector<1x8x256xf32> to vector<8x256xf32>
      %36 = vector.shape_cast %33 : vector<8x256xf32> to vector<1x8x256xf32>
      tpu.vector_store %arg10[%c0_28, %c0_29, %c0_30], %36 {strides = array<i32>} : memref<1x8x256xf32, #tpu.memory_space<vmem>>, vector<1x8x256xf32>,
      %c0_31 = arith.constant 0 : index
      %c0_32 = arith.constant 0 : index
      %c0_33 = arith.constant 0 : index
      %37 = vector.load %arg12[%c0_31, %c0_32, %c0_33] : memref<1x1x256xf32, #tpu.memory_space<vmem>>, vector<1x1x256xf32>
      %38 = vector.shape_cast %37 : vector<1x1x256xf32> to vector<1x256xf32>
      %39 = vector.shape_cast %30 : vector<1x256xf32> to vector<1x1x256xf32>
      tpu.vector_store %arg12[%c0_31, %c0_32, %c0_33], %39 {strides = array<i32>} : memref<1x1x256xf32, #tpu.memory_space<vmem>>, vector<1x1x256xf32>,
    } else {
    }
    return
  }
  func.func @transform_0(%arg0: i32, %arg1: i32, %arg2: i32) -> (i32, i32, i32) {
    %c0_i32 = arith.constant 0 : i32
    %c0_i32_0 = arith.constant 0 : i32
    return %arg1, %c0_i32, %arg2 : i32, i32, i32
  }
  func.func @transform_1(%arg0: i32, %arg1: i32, %arg2: i32) -> (i32, i32) {
    %c0_i32 = arith.constant 0 : i32
    return %arg2, %arg0 : i32, i32
  }
  func.func @transform_2(%arg0: i32, %arg1: i32, %arg2: i32) -> (i32, i32) {
    %c0_i32 = arith.constant 0 : i32
    return %arg2, %arg0 : i32, i32
  }
  func.func @transform_3(%arg0: i32, %arg1: i32, %arg2: i32) -> (i32, i32) {
    %c0_i32 = arith.constant 0 : i32
    %c0_i32_0 = arith.constant 0 : i32
    return %c0_i32, %arg0 : i32, i32
  }
  func.func @transform_4(%arg0: i32, %arg1: i32, %arg2: i32) -> (i32, i32) {
    %c0_i32 = arith.constant 0 : i32
    %c0_i32_0 = arith.constant 0 : i32
    return %c0_i32, %arg0 : i32, i32
  }
  func.func @transform_5(%arg0: i32, %arg1: i32, %arg2: i32) -> (i32, i32, i32) {
    %c0_i32 = arith.constant 0 : i32
    return %arg1, %arg2, %arg0 : i32, i32, i32
  }
  func.func @transform_6(%arg0: i32, %arg1: i32, %arg2: i32) -> (i32, i32, i32) {
    %c0_i32 = arith.constant 0 : i32
    %c0_i32_0 = arith.constant 0 : i32
    return %arg1, %c0_i32, %arg0 : i32, i32, i32
  }
  func.func @transform_7(%arg0: i32, %arg1: i32, %arg2: i32) -> (i32, i32, i32) {
    %c0_i32 = arith.constant 0 : i32
    %c0_i32_0 = arith.constant 0 : i32
    return %arg1, %c0_i32, %arg0 : i32, i32, i32
  }
  func.func @transform_8(%arg0: i32, %arg1: i32, %arg2: i32) -> (i32, i32, i32) {
    %c0_i32 = arith.constant 0 : i32
    return %arg1, %arg2, %arg0 : i32, i32, i32
  }
  func.func @transform_9(%arg0: i32, %arg1: i32, %arg2: i32) -> (i32, i32, i32) {
    %c0_i32 = arith.constant 0 : i32
    %c0_i32_0 = arith.constant 0 : i32
    return %arg1, %c0_i32, %arg0 : i32, i32, i32
  }
}

</mosaic_0001>

<bundles_post_ra>
// kernel: tpu_custom_call.1
= control target key start
LH: loop header
LB: loop body
LE: loop exit
PB: predicated region body
PF: predicated region fallthrough
CT: control target
= control target key end

     0   :  { %s2236_s0 = inlined_call_operand.hbm [shape: bf16[2,8,128], index: 0, kind: input, shape index: {}]   ;;  %s2237_s1 = inlined_call_operand.hbm [shape: bf16[128,256], index: 1, kind: input, shape index: {}]   ;;  %s2238_s2 = inlined_call_operand.hbm [shape: bf16[128,256], index: 2, kind: input, shape index: {}]   ;;  %s2239_s3 = inlined_call_operand.vmem [shape: f32[1,256], index: 3, kind: input, shape index: {}]   ;;  %s2240_s4 = inlined_call_operand.vmem [shape: f32[1,256], index: 4, kind: input, shape index: {}]   ;;  %s2241_s5 = inlined_call_operand.hbm [shape: bf16[2,128,256], index: 5, kind: input, shape index: {}]   ;;  %s2242_s6 = inlined_call_operand.vmem [shape: f32[2,1,256], index: 6, kind: input, shape index: {}]   ;;  %s2243_s7 = inlined_call_operand.hbm [shape: f32[2,8,256], index: 7, kind: output, shape index: {0}]   ;;  %s2244_s8 = inlined_call_operand.hbm [shape: f32[2,128,256], index: 8, kind: output, shape index: {1}]   ;;  %s2245_s9 = inlined_call_operand.hbm [shape: f32[2,1,256], index: 9, kind: output, shape index: {2}]  }
   0x1   :  { %2255 = sst [smem:[#allocation22_spill]] %s2236_s0 }
   0x2   :  { %2256 = sst [smem:[#allocation23_spill]] %s2237_s1 }
   0x3   :  { %2257 = sst [smem:[#allocation24_spill]] %s2238_s2 }
   0x4   :  { %2258 = sst [smem:[#allocation25_spill]] %s2243_s7 }
   0x5   :  { %15 = vsyncpa [#allocation4], 0 }
   0x6   :  { %17 = vsyncpa [#allocation4 + $0x1], 0 }
   0x7   :  { %18 = vsyncpa [#allocation7], 0 }
   0x8   :  { %19 = vsyncpa [#allocation10], 0 }
   0x9   :  { %21 = vsyncpa [#allocation10 + $0x1], 0 }
   0xa   :  { %22 = vsyncpa [#allocation5], 0 }
   0xb   :  { %24 = vsyncpa [#allocation5 + $0x1], 0 }
   0xc   :  { %25 = vsyncpa [#allocation13], 0 }
   0xd   :  { %27 = vsyncpa [#allocation13 + $0x1], 0  ;;  %s1752_s30 = smov 0   ;;  %s1754_s10 = smov 0  }
   0xe   :  { %s1756_s11 = smov 0   ;;  %s1758_s12 = smov 0  }
   0xf   :  { %s1760_s13 = smov 0   ;;  %s1762_s14 = smov 0  }
  0x10 LB: > { %2259 = sst [smem:[#allocation20_spill]] %s1668_s30  ;;  %s1783_s15 = sadd.s32 4294967295, %s1688_s14   ;;  %s1688_s14 = sphi %s1762_s14, %s33_s14   ;;  %s1684_s13 = sphi %s1760_s13, %s2288_s13   ;;  %s1680_s12 = sphi %s1758_s12, %s2287_s12   ;;  %s1676_s11 = sphi %s1756_s11, %s2286_s11   ;;  %s1672_s10 = sphi %s1754_s10, %s2285_s10   ;;  %s1668_s30 = sphi %s1752_s30, %s2284_s30  }
  0x11   : > { %s2246_s16 = sadd.s32 4294967294, %s1688_s14   ;;  %p74_p0 = scmp.ne.s32.totalorder %s1672_s10, %s1668_s30 }
  0x12   : > { %p2247_p1 = scmp.eq.s32.totalorder %s1783_s15, 0  ;;  %p272_p3 = scmp.eq.s32.totalorder %s2246_s16, 1 }
  0x13   : > { %p1252_p5 = scmp.ge.s32.totalorder %s1688_s14, 1  ;;  %p337_p7 = scmp.lt.s32.totalorder %s1688_s14, 3 }
  0x14   : > { %p1794_p4 = por %p2247_p1, %p74_p0  ;;  %p1799_p6 = por %p272_p3, %p74_p0 }
  0x15   : > { %p1804_p8 = pnand %p1252_p5, %p337_p7  ;;  %s1690_s20 = smov [#allocation6]  }
  0x16   : > { %s2260_s17 = scalar_select %p1794_p4, 1, 0 }
  0x17   : > { %s2261_s18 = scalar_select %p1799_p6, 1, 0 }
  0x18   : > { %s355_s21 = sshll.u32 %s1690_s20, 4  ;;  %p1337_p9 = pneg %p1804_p8  ;;  %s1808_s21 = int_to_ptr.vmem [resolvable:$true] %s355_s21 }
  0x19   : > { %2262 = sst [smem:[#allocation21_spill]] %s2261_s18  ;;  %s1691_s23 = smov [#allocation8]  }
  0x1a   : > { %p1815_p11 = pnand %p1337_p9, %p2247_p1  ;;  %s374_s24 = sshll.u32 %s1691_s23, 4  ;;  %s1819_s24 = int_to_ptr.vmem [resolvable:$true] %s374_s24 }
  0x1b   : > { %s2265_s1 = sld [smem:[#allocation23_spill]] }
  0x1c   : > { %p1424_p13 = pneg %p1815_p11 }
  0x21   : > { %s1422_s27 = scalar_lea.hbm %s2265_s1, 2048 }
  0x22   : > { %p1423_p12 = scmp.ne.s32.totalorder %s2265_s1, %s1422_s27  ;;  %p1429_p5 = scmp.lt.u32.totalorder %s1422_s27, %s2265_s1 }
  0x24   : > { %p1425_p0 = pnand %p1424_p13, %p1423_p12 }
  0x26   : > { %p1426_p3 = pneg %p1425_p0 }
  0x28   : > { %p1431_p7 = pnand %p1429_p5, %p1426_p3 }
  0x2a   : > { %1434 = shalt.err (!%p1431_p7)
}
  0x2b   : > { %s1435_s23 = scalar_lea.vmem %s1808_s21, 2048  ;;  %p1443_p2 = scmp.lt.s32.totalorder %s1808_s21, %s1808_s21 }
  0x2c   : > { %p1436_p9 = scmp.ne.s32.totalorder %s1808_s21, %s1435_s23  ;;  %p1444_p12 = scmp.lt.s32.totalorder %s1435_s23, %s1435_s23 }
  0x2e   : > { %p1438_p10 = pnand %p1436_p9, %p1424_p13  ;;  %p1445_p0 = por %p1444_p12, %p1443_p2 }
  0x30   : > { %p1439_p1 = pneg %p1438_p10 }
  0x32   : > { %p1446_p6 = pnand %p1445_p0, %p1439_p1 }
  0x34   : > { %1449 = shalt.err (!%p1446_p6)
}
  0x35   : > { %s2251_s16 = smov 128   ;;  %s2252_s25 = smov 8  }
  0x36   : > { %1340 = dma.hbm_to_vmem [thread:$0]  (!%p1815_p11), %s2265_s1, 2048, %s1808_s21, [#allocation7], %s2251_s16, %s2251_s16, %s2252_s25  }
  0x37   : > { %s2266_s2 = sld [smem:[#allocation24_spill]] }
  0x3d   : > { %s1450_s20 = scalar_lea.hbm %s2266_s2, 2048 }
  0x3e   : > { %p1451_p1 = scmp.ne.s32.totalorder %s2266_s2, %s1450_s20  ;;  %p1457_p10 = scmp.lt.u32.totalorder %s1450_s20, %s2266_s2 }
  0x40   : > { %p1453_p2 = pnand %p1451_p1, %p1424_p13 }
  0x42   : > { %p1454_p6 = pneg %p1453_p2 }
  0x44   : > { %p1459_p3 = pnand %p1457_p10, %p1454_p6 }
  0x46   : > { %1462 = shalt.err (!%p1459_p3)
}
  0x47   : > { %s1463_s21 = scalar_lea.vmem %s1819_s24, 2048  ;;  %p1471_p12 = scmp.lt.s32.totalorder %s1819_s24, %s1819_s24 }
  0x48   : > { %p1464_p5 = scmp.ne.s32.totalorder %s1819_s24, %s1463_s21  ;;  %p1472_p0 = scmp.lt.s32.totalorder %s1463_s21, %s1463_s21 }
  0x4a   : > { %p1466_p7 = pnand %p1464_p5, %p1424_p13  ;;  %p1473_p1 = por %p1472_p0, %p1471_p12 }
  0x4c   : > { %p1467_p9 = pneg %p1466_p7 }
  0x4e   : > { %p1474_p2 = pnand %p1473_p1, %p1467_p9 }
  0x50   : > { %1477 = shalt.err (!%p1474_p2)
}
  0x51   : > { %1343 = dma.hbm_to_vmem [thread:$0]  (!%p1815_p11), %s2266_s2, 2048, %s1819_s24, [#allocation7], %s2251_s16, %s2251_s16, %s2252_s25  }
  0x52   : > { %s48_s18 = sadd.s32 1, %s1684_s13  ;;  %s61_s22 = sadd.s32 1, %s1676_s11 }
  0x53   : > { %p50_p13 = scmp.ge.s32.totalorder %s48_s18, 2  ;;  %p68_p6 = scmp.ne.s32.totalorder %s1676_s11, %s1672_s10 }
  0x54   : > { %p69_p10 = scmp.eq.s32.totalorder %s1688_s14, 0  ;;  %p1363_p3 = scmp.lt.s32.totalorder %s1688_s14, 2 }
  0x55   : > { %s2290_s18 = smov (%p50_p13, %s48_s18), 0  ;;  %p2267_p7 = scmp.eq.s32.totalorder %s1783_s15, 1 }
  0x56   : > { %p70_p5 = por %p69_p10, %p68_p6  ;;  %s56_s27 = ssub.s32 %s1684_s13, %s2290_s18 }
  0x57   : > { %p1889_p9 = por %p2267_p7, %p68_p6  ;;  %s1896_s28 = sand.u32 1, %s1676_s11  }
  0x58   : > { %p59_p11 = scmp.eq.s32.totalorder %s56_s27, 0  ;;  %s1258_s24 = sshll.u32 %s1896_s28, 2 }
  0x59   : > { %s2268_s26 = scalar_select %p1889_p9, 1, 0 }
  0x5a   : > { %s1259_s29 = sshll.u32 %s1684_s13, 6  ;;  %s2269_s0 = sld [smem:[#allocation22_spill]] }
  0x5b   : > { %s1901_s20 = scalar_select %p59_p11, %s1676_s11, %s61_s22  }
  0x5c   : > { %s408_s30 = scalar_lea.vmem [#allocation3], %s1258_s24  ;;  %p1910_p12 = pnand %p1363_p3, %p70_p5 }
  0x5d   : > { %s416_s16 = sshll.u32 %s408_s30, 4  ;;  %s405_s27 = scalar_lea.sflag [#allocation4], %s1896_s28  ;;  %s1914_s16 = int_to_ptr.vmem [resolvable:$true] %s416_s16 }
  0x5e   : > { %p1480_p1 = pneg %p1910_p12 }
  0x60   : > { %s1906_s7 = scalar_lea.hbm %s2269_s0, %s1259_s29  ;;  %s1483_s21 = scalar_lea.hbm %s2269_s0, 128 }
  0x61   : > { %s1478_s23 = scalar_lea.hbm %s1906_s7, 64  ;;  %p1484_p6 = scmp.lt.u32.totalorder %s1906_s7, %s2269_s0 }
  0x62   : > { %p1479_p0 = scmp.ne.s32.totalorder %s1906_s7, %s1478_s23  ;;  %p1485_p10 = scmp.lt.u32.totalorder %s1483_s21, %s1478_s23 }
  0x63   : > { %p1487_p5 = scmp.lt.u32.totalorder %s1478_s23, %s1906_s7 }
  0x64   : > { %p1481_p2 = pnand %p1480_p1, %p1479_p0  ;;  %p1486_p3 = por %p1485_p10, %p1484_p6 }
  0x66   : > { %p1482_p13 = pneg %p1481_p2  ;;  %p1488_p7 = por %p1487_p5, %p1486_p3 }
  0x68   : > { %p1489_p11 = pnand %p1488_p7, %p1482_p13 }
  0x6a   : > { %1492 = shalt.err (!%p1489_p11)
}
  0x6b   : > { %s1493_s22 = scalar_lea.vmem %s1914_s16, 64  ;;  %s1694_s24 = smov [#allocation3]  }
  0x6c   : > { %p1494_p0 = scmp.ne.s32.totalorder %s1914_s16, %s1493_s22  ;;  %s1498_s29 = sshll.u32 %s1694_s24, 4  ;;  %s1499_s29 = int_to_ptr.vmem [resolvable:$false] %s1498_s29 }
  0x6d   : > { %s1500_s1 = scalar_lea.vmem %s1499_s29, 128  ;;  %p1501_p4 = scmp.lt.s32.totalorder %s1914_s16, %s1499_s29 }
  0x6e   : > { %p1496_p2 = pnand %p1494_p0, %p1480_p1  ;;  %p1502_p6 = scmp.lt.s32.totalorder %s1500_s1, %s1493_s22 }
  0x70   : > { %p1497_p9 = pneg %p1496_p2  ;;  %p1503_p10 = por %p1502_p6, %p1501_p4 }
  0x72   : > { %p1504_p3 = pnand %p1503_p10, %p1497_p9 }
  0x74   : > { %1507 = shalt.err (!%p1504_p3)
}
  0x75   : > { %1347 = dma.hbm_to_vmem [thread:$0]  (!%p1910_p12), %s1906_s7, 64, %s1914_s16, %s405_s27  }
  0x76   : > { %s1283_s23 = sshll.u32 %s1684_s13, 11  ;;  %s2271_s29 = sshll.u32 %s1896_s28, 7 }
  0x77   : > { %s1947_s24 = scalar_lea.hbm %s2241_s5, %s1283_s23  ;;  %s427_s22 = scalar_lea.vmem [#allocation9], %s2271_s29 }
  0x78   : > { %s439_s1 = sshll.u32 %s427_s22, 4  ;;  %s424_s0 = scalar_lea.sflag [#allocation10], %s1896_s28  ;;  %s1951_s1 = int_to_ptr.vmem [resolvable:$true] %s439_s1 }
  0x79   : > { %s1508_s2 = scalar_lea.hbm %s1947_s24, 2048  ;;  %s1513_s27 = scalar_lea.hbm %s2241_s5, 4096 }
  0x7a   : > { %p1509_p4 = scmp.ne.s32.totalorder %s1947_s24, %s1508_s2  ;;  %p1514_p5 = scmp.lt.u32.totalorder %s1947_s24, %s2241_s5 }
  0x7b   : > { %p1515_p7 = scmp.lt.u32.totalorder %s1513_s27, %s1508_s2  ;;  %p1517_p0 = scmp.lt.u32.totalorder %s1508_s2, %s1947_s24 }
  0x7c   : > { %p1511_p9 = pnand %p1509_p4, %p1480_p1 }
  0x7d   : > { %p1516_p11 = por %p1515_p7, %p1514_p5 }
  0x7e   : > { %p1512_p13 = pneg %p1511_p9 }
  0x7f   : > { %p1518_p2 = por %p1517_p0, %p1516_p11 }
  0x81   : > { %p1519_p6 = pnand %p1518_p2, %p1512_p13 }
  0x83   : > { %1522 = shalt.err (!%p1519_p6)
}
  0x84   : > { %s1523_s30 = scalar_lea.vmem %s1951_s1, 2048  ;;  %s1695_s29 = smov [#allocation9]  }
  0x85   : > { %p1524_p10 = scmp.ne.s32.totalorder %s1951_s1, %s1523_s30  ;;  %s1528_s22 = sshll.u32 %s1695_s29, 4  ;;  %s1529_s22 = int_to_ptr.vmem [resolvable:$false] %s1528_s22 }
  0x86   : > { %s1530_s16 = scalar_lea.vmem %s1529_s22, 4096  ;;  %p1531_p9 = scmp.lt.s32.totalorder %s1951_s1, %s1529_s22 }
  0x87   : > { %p1526_p3 = pnand %p1524_p10, %p1480_p1  ;;  %p1532_p5 = scmp.lt.s32.totalorder %s1530_s16, %s1523_s30 }
  0x89   : > { %p1527_p4 = pneg %p1526_p3  ;;  %p1533_p7 = por %p1532_p5, %p1531_p9 }
  0x8b   : > { %p1534_p11 = pnand %p1533_p7, %p1527_p4 }
  0x8d   : > { %1537 = shalt.err (!%p1534_p11)
}
  0x8e   : > { %s2272_s2 = smov 8   ;;  %s2273_s7 = smov 128  }
  0x8f   : > { %1350 = dma.hbm_to_vmem [thread:$0]  (!%p1910_p12), %s1947_s24, 2048, %s1951_s1, %s424_s0, %s2273_s7, %s2273_s7, %s2272_s2  }
  0x90   : > { %463 = sbr.rel (%p1804_p8) target bundleno = 440 (0x1b8), region = 48  ;;  %s1985_s27 = sand.u32 (!%p1804_p8), 1, %s1672_s10  }
  0x91   : > { %s1264_s23 = sshll.u32 (!%p1804_p8), %s1985_s27, 2  ;;  %s466_s21 = scalar_lea.sflag (!%p1804_p8), [#allocation4], %s1985_s27 }
  0x92   : > { %s1989_s25 = scalar_lea.vmem (!%p1804_p8), [#allocation3], %s1264_s23  ;;  %p2274_p1 = scmp.ne.s32.totalorder (!%p1804_p8), %s2260_s17, 0 }
  0x97   : > { %1647 = dma.done.wait (%p2274_p1), %s466_s21, 64  }
  0x98   : > { %1649 = vsyncadd (%p2274_p1), %s466_s21, 4294967232  ;;  %p2275_p12 = scmp.eq.s32.totalorder %s1783_s15, 0 }
  0x9a   : > { %1651 = dma.done.wait (%p2275_p12), [#allocation7], 4096   ;;  %p2276_p8 = pmov %p2275_p12 }
  0x9b   : > { %s1267_s0 = sshll.u32 %s1985_s27, 7  ;;  %s483_s19 = scalar_lea.sflag [#allocation10], %s1985_s27 }
  0x9c   : > { %1653 = vsyncadd (%p2276_p8), [#allocation7], 4294963200  ;;  %s2001_s28 = scalar_lea.vmem [#allocation9], %s1267_s0 }
  0x9d   : > { %1655 = dma.done.wait (%p2274_p1), %s483_s19, 2048  }
  0x9e   : > { %1657 = vsyncadd (%p2274_p1), %s483_s19, 4294965248  ;;  %v1696_v0 = vmov 0.0   ;;  %v587_v1 = vld [vmem:[#allocation6] sm:$0xff]  ;;  %v588_v2 = vld [vmem:[#allocation6 + $0x8] sm:$0xff]  ;;  %s1269_s24 = sshll.u32 %s1985_s27, 8  ;;  %p569_p13 = scmp.lt.s32.totalorder %s1680_s12, 1 }
  0x9f   : > { %863 = vmatprep.mubr.f32.mxu0 %v1696_v0  ;;  %v635_v3 = vld [vmem:[#allocation8] sm:$0xff]  ;;  %v604_v4 = vunpack.c.h.bf16 %v587_v1  ;;  %v606_v5 = vunpack.c.h.bf16 %v588_v2  ;;  %v636_v6 = vld [vmem:[#allocation8 + $0x8] sm:$0xff]  ;;  %v603_v10 = vunpack.c.l.bf16 %v587_v1  ;;  %v605_v14 = vunpack.c.l.bf16 %v588_v2  ;;  %v2010_v15 = vld [vmem:[#allocation6 + $0x10] sm:$0xff]  ;;  %s2026_s17 = scalar_lea.vmem [#allocation12], %s1269_s24  ;;  %s941_s0 = sand.u32 1, %s1783_s15  }
  0xa0   : > { %v652_v7 = vunpack.c.h.bf16 %v635_v3  ;;  %v683_v8 = vld [vmem:[%s2001_s28] sm:$0xff]  ;;  %v684_v9 = vld [vmem:[%s2001_s28 + $0x8] sm:$0xff]  ;;  %v654_v11 = vunpack.c.h.bf16 %v636_v6  ;;  %v2012_v16 = vld [vmem:[#allocation6 + $0x18] sm:$0xff]  ;;  %v651_v18 = vunpack.c.l.bf16 %v635_v3  ;;  %v653_v19 = vunpack.c.l.bf16 %v636_v6  ;;  %s570_s1 = scalar_select %p569_p13, %s1680_s12, 1 }
  0xa1   : > { %v700_v12 = vunpack.c.h.bf16 %v683_v8  ;;  %v702_v13 = vunpack.c.h.bf16 %v684_v9  ;;  %v637_v17 = vld [vmem:[#allocation8 + $0x10] sm:$0xff]  ;;  %v699_v20 = vunpack.c.l.bf16 %v683_v8  ;;  %v701_v21 = vunpack.c.l.bf16 %v684_v9  ;;  %v638_v22 = vld [vmem:[#allocation8 + $0x18] sm:$0xff]  ;;  %v2020_v41 = vld [vmem:[#allocation6 + $0x20] sm:$0xff]  ;;  %s1285_s19 = sshll.u32 %s1680_s12, 12  ;;  %s2135_s29 = scalar_lea.sflag [#allocation13], %s941_s0 }
  0xa2   : > { %v685_v23 = vld [vmem:[%s2001_s28 + $0x10] sm:$0xff]  ;;  %v686_v24 = vld [vmem:[%s2001_s28 + $0x18] sm:$0xff]  ;;  %v608_v27 = vunpack.c.h.bf16 %v2010_v15  ;;  %v610_v28 = vunpack.c.h.bf16 %v2012_v16  ;;  %v656_v31 = vunpack.c.h.bf16 %v637_v17  ;;  %v658_v32 = vunpack.c.h.bf16 %v638_v22  ;;  %v2022_v42 = vld [vmem:[#allocation6 + $0x28] sm:$0xff]  ;;  %s1271_s30 = sshll.u32 %s570_s1, 1  ;;  %s2130_s1 = scalar_lea.hbm %s2244_s8, %s1285_s19 }
  0xa3   : > { %v732_v25 = vmul.f32 %v700_v12, %v652_v7  ;;  %v734_v26 = vmul.f32 %v702_v13, %v654_v11  ;;  %v731_v29 = vmul.f32 %v699_v20, %v651_v18  ;;  %v733_v30 = vmul.f32 %v701_v21, %v653_v19  ;;  %v639_v47 = vld [vmem:[#allocation8 + $0x20] sm:$0xff]  ;;  %v640_v48 = vld [vmem:[#allocation8 + $0x28] sm:$0xff]  ;;  %v2039_v3 = vld [vmem:[#allocation6 + $0x30] sm:$0xff]  ;;  %s575_s16 = scalar_lea.vmem %s2242_s6, %s1271_s30  ;;  %s981_s30 = sshll.u32 %s2026_s17, 4  ;;  %s2133_s30 = int_to_ptr.vmem [resolvable:$true] %s981_s30 }
  0xa4   : > { %v704_v35 = vunpack.c.h.bf16 %v685_v23  ;;  %v706_v36 = vunpack.c.h.bf16 %v686_v24  ;;  %v607_v39 = vunpack.c.l.bf16 %v2010_v15  ;;  %v609_v40 = vunpack.c.l.bf16 %v2012_v16  ;;  %v687_v53 = vld [vmem:[%s2001_s28 + $0x20] sm:$0xff]  ;;  %v688_v54 = vld [vmem:[%s2001_s28 + $0x28] sm:$0xff]  ;;  %v641_v9 = vld [vmem:[#allocation8 + $0x30] sm:$0xff]  ;;  %s1538_s22 = scalar_lea.vmem %s2133_s30, 4096  ;;  %p2277_p2 = scmp.ne.s32.totalorder %s2268_s26, 0 }
  0xa5   : > { %v764_v33 = vadd.f32 %v732_v25, %v604_v4  ;;  %v766_v34 = vadd.f32 %v734_v26, %v606_v5  ;;  %v763_v37 = vadd.f32 %v731_v29, %v603_v10  ;;  %v765_v38 = vadd.f32 %v733_v30, %v605_v14  ;;  %v2041_v4 = vld [vmem:[#allocation6 + $0x38] sm:$0xff]  ;;  %v689_v15 = vld [vmem:[%s2001_s28 + $0x30] sm:$0xff]  ;;  %v2050_v29 = vld [vmem:[#allocation6 + $0x40] sm:$0xff]  ;;  %p1539_p0 = scmp.ne.s32.totalorder %s2133_s30, %s1538_s22  ;;  %s1697_s15 = smov [#allocation12]  }
  0xa6   : > { %v736_v44 = vmul.f32 %v704_v35, %v656_v31  ;;  %v738_v45 = vmul.f32 %v706_v36, %v658_v32  ;;  %v655_v46 = vunpack.c.l.bf16 %v637_v17  ;;  %v657_v50 = vunpack.c.l.bf16 %v638_v22  ;;  %v642_v14 = vld [vmem:[#allocation8 + $0x38] sm:$0xff] }
  0xa7   : > { %v1287_v43 = vpack.c.bf16 %v766_v34, %v764_v33  ;;  %875 = vst [vmem:[%s2026_s17 + $0x8] sm:$0xff] %v764_v33  ;;  %877 = vst [vmem:[%s2026_s17 + $0x18] sm:$0xff] %v766_v34  ;;  %v1289_v49 = vpack.c.bf16 %v765_v38, %v763_v37  ;;  %v703_v51 = vunpack.c.l.bf16 %v685_v23  ;;  %v705_v52 = vunpack.c.l.bf16 %v686_v24  ;;  %v690_v16 = vld [vmem:[%s2001_s28 + $0x38] sm:$0xff]  ;;  %v2056_v34 = vld [vmem:[#allocation6 + $0x48] sm:$0xff]  ;;  %p1540_p6 = pnand %p1539_p0, %p2277_p2 }
  0xa8   : > { %874 = vst [vmem:[%s2026_s17] sm:$0xff] %v763_v37  ;;  %876 = vst [vmem:[%s2026_s17 + $0x10] sm:$0xff] %v765_v38  ;;  %v768_v55 = vadd.f32 %v736_v44, %v608_v27  ;;  %v770_v56 = vadd.f32 %v738_v45, %v610_v28  ;;  %v612_v57 = vunpack.c.h.bf16 %v2020_v41  ;;  %v614_v58 = vunpack.c.h.bf16 %v2022_v42  ;;  %v691_v45 = vld [vmem:[%s2001_s28 + $0x40] sm:$0xff] }
  0xa9   : > { %1288 = vmatprep.subr.bf16.mxu0 %v1287_v43  ;;  %v735_v59 = vmul.f32 %v703_v51, %v655_v46  ;;  %v737_v60 = vmul.f32 %v705_v52, %v657_v50  ;;  %v660_v61 = vunpack.c.h.bf16 %v639_v47  ;;  %v662_v62 = vunpack.c.h.bf16 %v640_v48  ;;  %v692_v46 = vld [vmem:[%s2001_s28 + $0x48] sm:$0xff]  ;;  %p1541_p10 = pneg %p1540_p6 }
  0xaa   : > { %1290 = vmatpush1.bf16.msra.mxu0 %v1289_v49  ;;  %v1291_v63 = vpack.c.bf16 %v770_v56, %v768_v55  ;;  %879 = vst [vmem:[%s2026_s17 + $0x28] sm:$0xff] %v768_v55  ;;  %881 = vst [vmem:[%s2026_s17 + $0x38] sm:$0xff] %v770_v56  ;;  %v708_v0 = vunpack.c.h.bf16 %v687_v53  ;;  %v710_v1 = vunpack.c.h.bf16 %v688_v54  ;;  %v611_v2 = vunpack.c.l.bf16 %v2020_v41 }
  0xab   : > { %v767_v5 = vadd.f32 %v735_v59, %v607_v39  ;;  %v769_v6 = vadd.f32 %v737_v60, %v609_v40  ;;  %v613_v7 = vunpack.c.l.bf16 %v2022_v42  ;;  %v659_v8 = vunpack.c.l.bf16 %v639_v47  ;;  %v643_v39 = vld [vmem:[#allocation8 + $0x40] sm:$0xff]  ;;  %v644_v40 = vld [vmem:[#allocation8 + $0x48] sm:$0xff]  ;;  %v2067_v59 = vld [vmem:[#allocation6 + $0x50] sm:$0xff] }
  0xac   : > { %1292 = vmatprep.subr.bf16.mxu0 %v1291_v63  ;;  %v740_v10 = vmul.f32 %v708_v0, %v660_v61  ;;  %v742_v11 = vmul.f32 %v710_v1, %v662_v62  ;;  %v661_v12 = vunpack.c.l.bf16 %v640_v48  ;;  %v707_v13 = vunpack.c.l.bf16 %v687_v53  ;;  %v2069_v60 = vld [vmem:[#allocation6 + $0x58] sm:$0xff]  ;;  %v645_v1 = vld [vmem:[#allocation8 + $0x50] sm:$0xff] }
  0xad   : > { %v1293_v17 = vpack.c.bf16 %v769_v6, %v767_v5  ;;  %878 = vst [vmem:[%s2026_s17 + $0x20] sm:$0xff] %v767_v5  ;;  %880 = vst [vmem:[%s2026_s17 + $0x30] sm:$0xff] %v769_v6  ;;  %v709_v18 = vunpack.c.l.bf16 %v688_v54  ;;  %v616_v19 = vunpack.c.h.bf16 %v2039_v3  ;;  %v618_v20 = vunpack.c.h.bf16 %v2041_v4  ;;  %v646_v6 = vld [vmem:[#allocation8 + $0x58] sm:$0xff] }
  0xae   : > { %v772_v21 = vadd.f32 %v740_v10, %v612_v57  ;;  %v774_v22 = vadd.f32 %v742_v11, %v614_v58  ;;  %v739_v23 = vmul.f32 %v707_v13, %v659_v8  ;;  %v664_v24 = vunpack.c.h.bf16 %v641_v9  ;;  %v694_v8 = vld [vmem:[%s2001_s28 + $0x58] sm:$0xff] }
  0xaf   : > { %1294 = vmatpush1.bf16.msra.mxu0 %v1293_v17  ;;  %v741_v25 = vmul.f32 %v709_v18, %v661_v12  ;;  %v666_v26 = vunpack.c.h.bf16 %v642_v14  ;;  %v712_v27 = vunpack.c.h.bf16 %v689_v15  ;;  %v714_v28 = vunpack.c.h.bf16 %v690_v16 }
  0xb0   : > { %v1295_v30 = vpack.c.bf16 %v774_v22, %v772_v21  ;;  %883 = vst [vmem:[%s2026_s17 + $0x48] sm:$0xff] %v772_v21  ;;  %885 = vst [vmem:[%s2026_s17 + $0x58] sm:$0xff] %v774_v22  ;;  %v771_v31 = vadd.f32 %v739_v23, %v611_v2  ;;  %v615_v32 = vunpack.c.l.bf16 %v2039_v3  ;;  %v617_v33 = vunpack.c.l.bf16 %v2041_v4  ;;  %v2078_v21 = vld [vmem:[#allocation6 + $0x60] sm:$0xff] }
  0xb1   : > { %v773_v35 = vadd.f32 %v741_v25, %v613_v7  ;;  %v744_v36 = vmul.f32 %v712_v27, %v664_v24  ;;  %v746_v37 = vmul.f32 %v714_v28, %v666_v26  ;;  %v663_v38 = vunpack.c.l.bf16 %v641_v9  ;;  %v693_v7 = vld [vmem:[%s2001_s28 + $0x50] sm:$0xff]  ;;  %v2084_v26 = vld [vmem:[#allocation6 + $0x68] sm:$0xff] }
  0xb2   : > { %1296 = vmatprep.subr.bf16.mxu0 %v1295_v30  ;;  %882 = vst [vmem:[%s2026_s17 + $0x40] sm:$0xff] %v771_v31  ;;  %v665_v41 = vunpack.c.l.bf16 %v642_v14  ;;  %v711_v42 = vunpack.c.l.bf16 %v689_v15  ;;  %v713_v43 = vunpack.c.l.bf16 %v690_v16  ;;  %v620_v44 = vunpack.c.h.bf16 %v2050_v29 }
  0xb3   : > { %v1297_v47 = vpack.c.bf16 %v773_v35, %v771_v31  ;;  %884 = vst [vmem:[%s2026_s17 + $0x50] sm:$0xff] %v773_v35  ;;  %v776_v48 = vadd.f32 %v744_v36, %v616_v19  ;;  %v778_v49 = vadd.f32 %v746_v37, %v618_v20  ;;  %v622_v50 = vunpack.c.h.bf16 %v2056_v34  ;;  %v647_v31 = vld [vmem:[#allocation8 + $0x60] sm:$0xff] }
  0xb4   : > { %v743_v51 = vmul.f32 %v711_v42, %v663_v38  ;;  %v745_v52 = vmul.f32 %v713_v43, %v665_v41  ;;  %v668_v53 = vunpack.c.h.bf16 %v643_v39  ;;  %v670_v54 = vunpack.c.h.bf16 %v644_v40  ;;  %v695_v37 = vld [vmem:[%s2001_s28 + $0x60] sm:$0xff]  ;;  %v696_v38 = vld [vmem:[%s2001_s28 + $0x68] sm:$0xff] }
  0xb5   : > { %1298 = vmatpush1.bf16.msra.mxu0 %v1297_v47  ;;  %v1299_v55 = vpack.c.bf16 %v778_v49, %v776_v48  ;;  %887 = vst [vmem:[%s2026_s17 + $0x68] sm:$0xff] %v776_v48  ;;  %889 = vst [vmem:[%s2026_s17 + $0x78] sm:$0xff] %v778_v49  ;;  %v716_v56 = vunpack.c.h.bf16 %v691_v45  ;;  %v718_v57 = vunpack.c.h.bf16 %v692_v46  ;;  %v619_v58 = vunpack.c.l.bf16 %v2050_v29 }
  0xb6   : > { %v775_v61 = vadd.f32 %v743_v51, %v615_v32  ;;  %v777_v62 = vadd.f32 %v745_v52, %v617_v33  ;;  %v621_v63 = vunpack.c.l.bf16 %v2056_v34  ;;  %v667_v0 = vunpack.c.l.bf16 %v643_v39  ;;  %v648_v32 = vld [vmem:[#allocation8 + $0x68] sm:$0xff]  ;;  %v601_v51 = vld [vmem:[#allocation6 + $0x70] sm:$0xff]  ;;  %v602_v52 = vld [vmem:[#allocation6 + $0x78] sm:$0xff] }
  0xb7   : > { %1300 = vmatprep.subr.bf16.mxu0 %v1299_v55  ;;  %v748_v2 = vmul.f32 %v716_v56, %v668_v53  ;;  %v750_v3 = vmul.f32 %v718_v57, %v670_v54  ;;  %v669_v4 = vunpack.c.l.bf16 %v644_v40  ;;  %v715_v5 = vunpack.c.l.bf16 %v691_v45  ;;  %v649_v57 = vld [vmem:[#allocation8 + $0x70] sm:$0xff] }
  0xb8   : > { %v1301_v9 = vpack.c.bf16 %v777_v62, %v775_v61  ;;  %886 = vst [vmem:[%s2026_s17 + $0x60] sm:$0xff] %v775_v61  ;;  %888 = vst [vmem:[%s2026_s17 + $0x70] sm:$0xff] %v777_v62  ;;  %v717_v10 = vunpack.c.l.bf16 %v692_v46  ;;  %v624_v11 = vunpack.c.h.bf16 %v2067_v59  ;;  %v626_v12 = vunpack.c.h.bf16 %v2069_v60  ;;  %v650_v62 = vld [vmem:[#allocation8 + $0x78] sm:$0xff] }
  0xb9   : > { %v780_v13 = vadd.f32 %v748_v2, %v620_v44  ;;  %v782_v14 = vadd.f32 %v750_v3, %v622_v50  ;;  %v747_v15 = vmul.f32 %v715_v5, %v667_v0  ;;  %v672_v16 = vunpack.c.h.bf16 %v645_v1  ;;  %v698_v0 = vld [vmem:[%s2001_s28 + $0x78] sm:$0xff] }
  0xba   : > { %1302 = vmatpush1.bf16.msra.mxu0 %v1301_v9  ;;  %v749_v17 = vmul.f32 %v717_v10, %v669_v4  ;;  %v674_v18 = vunpack.c.h.bf16 %v646_v6  ;;  %v720_v19 = vunpack.c.h.bf16 %v693_v7  ;;  %v722_v20 = vunpack.c.h.bf16 %v694_v8 }
  0xbb   : > { %v1303_v22 = vpack.c.bf16 %v782_v14, %v780_v13  ;;  %891 = vst [vmem:[%s2026_s17 + $0x88] sm:$0xff] %v780_v13  ;;  %893 = vst [vmem:[%s2026_s17 + $0x98] sm:$0xff] %v782_v14  ;;  %v779_v23 = vadd.f32 %v747_v15, %v619_v58  ;;  %v623_v24 = vunpack.c.l.bf16 %v2067_v59  ;;  %v625_v25 = vunpack.c.l.bf16 %v2069_v60 }
  0xbc   : > { %v781_v27 = vadd.f32 %v749_v17, %v621_v63  ;;  %v752_v28 = vmul.f32 %v720_v19, %v672_v16  ;;  %v754_v29 = vmul.f32 %v722_v20, %v674_v18  ;;  %v671_v30 = vunpack.c.l.bf16 %v645_v1  ;;  %v697_v63 = vld [vmem:[%s2001_s28 + $0x70] sm:$0xff] }
  0xbd   : > { %1304 = vmatprep.subr.bf16.mxu0 %v1303_v22  ;;  %890 = vst [vmem:[%s2026_s17 + $0x80] sm:$0xff] %v779_v23  ;;  %v673_v33 = vunpack.c.l.bf16 %v646_v6  ;;  %v719_v34 = vunpack.c.l.bf16 %v693_v7  ;;  %v721_v35 = vunpack.c.l.bf16 %v694_v8  ;;  %v628_v36 = vunpack.c.h.bf16 %v2078_v21 }
  0xbe   : > { %v1305_v39 = vpack.c.bf16 %v781_v27, %v779_v23  ;;  %892 = vst [vmem:[%s2026_s17 + $0x90] sm:$0xff] %v781_v27  ;;  %v784_v40 = vadd.f32 %v752_v28, %v624_v11  ;;  %v786_v41 = vadd.f32 %v754_v29, %v626_v12  ;;  %v630_v42 = vunpack.c.h.bf16 %v2084_v26 }
  0xbf   : > { %v751_v43 = vmul.f32 %v719_v34, %v671_v30  ;;  %v753_v44 = vmul.f32 %v721_v35, %v673_v33  ;;  %v676_v45 = vunpack.c.h.bf16 %v647_v31  ;;  %v678_v46 = vunpack.c.h.bf16 %v648_v32 }
  0xc0   : > { %1306 = vmatpush1.bf16.msra.mxu0 %v1305_v39  ;;  %v1307_v47 = vpack.c.bf16 %v786_v41, %v784_v40  ;;  %895 = vst [vmem:[%s2026_s17 + $0xa8] sm:$0xff] %v784_v40  ;;  %897 = vst [vmem:[%s2026_s17 + $0xb8] sm:$0xff] %v786_v41  ;;  %v724_v48 = vunpack.c.h.bf16 %v695_v37  ;;  %v726_v49 = vunpack.c.h.bf16 %v696_v38  ;;  %v627_v50 = vunpack.c.l.bf16 %v2078_v21  ;;  %v909_v40 = vld [vmem:[%s2239_s3] sm:$0x3] }
  0xc1   : > { %v783_v53 = vadd.f32 %v751_v43, %v623_v24  ;;  %v785_v54 = vadd.f32 %v753_v44, %v625_v25  ;;  %v629_v55 = vunpack.c.l.bf16 %v2084_v26  ;;  %v675_v56 = vunpack.c.l.bf16 %v647_v31 }
  0xc2   : > { %1308 = vmatprep.subr.bf16.mxu0 %v1307_v47  ;;  %v756_v58 = vmul.f32 %v724_v48, %v676_v45  ;;  %v758_v59 = vmul.f32 %v726_v49, %v678_v46  ;;  %v677_v60 = vunpack.c.l.bf16 %v648_v32  ;;  %v723_v61 = vunpack.c.l.bf16 %v695_v37  ;;  %v797_v32 = vld [vmem:[%s1989_s25] sm:$0xf]  ;;  %s1270_s25 = sshll.u32 %s1985_s27, 1 }
  0xc3   : > { %v1309_v1 = vpack.c.bf16 %v785_v54, %v783_v53  ;;  %894 = vst [vmem:[%s2026_s17 + $0xa0] sm:$0xff] %v783_v53  ;;  %896 = vst [vmem:[%s2026_s17 + $0xb0] sm:$0xff] %v785_v54  ;;  %v725_v2 = vunpack.c.l.bf16 %v696_v38  ;;  %v632_v3 = vunpack.c.h.bf16 %v601_v51  ;;  %v634_v4 = vunpack.c.h.bf16 %v602_v52  ;;  %v911_v37 = vld [vmem:[%s575_s16] sm:$0x3]  ;;  %s1542_s16 = sshll.u32 %s1697_s15, 4  ;;  %s1543_s16 = int_to_ptr.vmem [resolvable:$false] %s1542_s16 }
  0xc4   : > { %v788_v5 = vadd.f32 %v756_v58, %v628_v36  ;;  %v790_v6 = vadd.f32 %v758_v59, %v630_v42  ;;  %v755_v7 = vmul.f32 %v723_v61, %v675_v56  ;;  %v680_v8 = vunpack.c.h.bf16 %v649_v57  ;;  %v910_v36 = vld [vmem:[%s2240_s4] sm:$0x3]  ;;  %s1544_s2 = scalar_lea.vmem %s1543_s16, 8192  ;;  %p1545_p3 = scmp.lt.s32.totalorder %s2133_s30, %s1543_s16 }
  0xc5   : > { %1310 = vmatpush1.bf16.msra.mxu0 %v1309_v1  ;;  %v757_v9 = vmul.f32 %v725_v2, %v677_v60  ;;  %v682_v10 = vunpack.c.h.bf16 %v650_v62  ;;  %v728_v11 = vunpack.c.h.bf16 %v697_v63  ;;  %v730_v12 = vunpack.c.h.bf16 %v698_v0  ;;  %p1546_p4 = scmp.lt.s32.totalorder %s1544_s2, %s1538_s22 }
  0xc6   : > { %v1311_v13 = vpack.c.bf16 %v790_v6, %v788_v5  ;;  %899 = vst [vmem:[%s2026_s17 + $0xc8] sm:$0xff] %v788_v5  ;;  %901 = vst [vmem:[%s2026_s17 + $0xd8] sm:$0xff] %v790_v6  ;;  %v787_v14 = vadd.f32 %v755_v7, %v627_v50  ;;  %v631_v15 = vunpack.c.l.bf16 %v601_v51  ;;  %v679_v19 = vunpack.c.l.bf16 %v649_v57 }
  0xc7   : > { %v789_v16 = vadd.f32 %v757_v9, %v629_v55  ;;  %v760_v17 = vmul.f32 %v728_v11, %v680_v8  ;;  %v762_v18 = vmul.f32 %v730_v12, %v682_v10  ;;  %v633_v20 = vunpack.c.l.bf16 %v602_v52  ;;  %p1547_p9 = por %p1546_p4, %p1545_p3 }
  0xc8   : > { %1312 = vmatprep.subr.bf16.mxu0 %v1311_v13  ;;  %898 = vst [vmem:[%s2026_s17 + $0xc0] sm:$0xff] %v787_v14  ;;  %v681_v21 = vunpack.c.l.bf16 %v650_v62  ;;  %v727_v22 = vunpack.c.l.bf16 %v697_v63  ;;  %v729_v23 = vunpack.c.l.bf16 %v698_v0  ;;  %v798_v34 = vunpack.c.l.bf16 %v797_v32 }
  0xc9   : > { %v1313_v24 = vpack.c.bf16 %v789_v16, %v787_v14  ;;  %900 = vst [vmem:[%s2026_s17 + $0xd0] sm:$0xff] %v789_v16  ;;  %v792_v25 = vadd.f32 %v760_v17, %v632_v3  ;;  %v794_v26 = vadd.f32 %v762_v18, %v634_v4  ;;  %v917_v35 = vlaneseq  ;;  %p1548_p5 = pnand %p1547_p9, %p1541_p10 }
  0xca   : > { %v759_v27 = vmul.f32 %v727_v22, %v679_v19  ;;  %v761_v28 = vmul.f32 %v729_v23, %v681_v21  ;;  %v912_v38 = vmul.f32 %v911_v37, %v910_v36 }
  0xcb   : > { %1314 = vmatpush1.bf16.msra.mxu0 %v1313_v24  ;;  %v1315_v29 = vpack.c.bf16 %v794_v26, %v792_v25  ;;  %903 = vst [vmem:[%s2026_s17 + $0xe8] sm:$0xff] %v792_v25  ;;  %905 = vst [vmem:[%s2026_s17 + $0xf8] sm:$0xff] %v794_v26  ;;  %v918_v39 = vshrl.u32 %v917_v35, 7 }
  0xcc   : > { %v791_v30 = vadd.f32 %v759_v27, %v631_v15  ;;  %v793_v31 = vadd.f32 %v761_v28, %v633_v20  ;;  %v913_v41 = vadd.f32 %v912_v38, %v909_v40 }
  0xcd   : > { %1316 = vmatprep.subr.bf16.mxu0 %v1315_v29  ;;  %v919_v42 = vsub.s32 0, %v918_v39  ;;  %v923_v43 = vsub.s32 1, %v918_v39 }
  0xce   : > { %v1317_v33 = vpack.c.bf16 %v793_v31, %v791_v30  ;;  %902 = vst [vmem:[%s2026_s17 + $0xe0] sm:$0xff] %v791_v30  ;;  %904 = vst [vmem:[%s2026_s17 + $0xf0] sm:$0xff] %v793_v31 }
  0xcf   : > { %v2120_v44 = vrot.slane %v913_v41, %v919_v42  ;;  %v2122_v45 = vrot.slane %v913_v41, %v923_v43 }
  0xd0   : > { %1318 = vmatpush1.bf16.msra.mxu0 %v1317_v33 }
  0xd3   : > { %864 = vmatmul.mubr.f32.vlgmr.msra.gmra.mrb[0].mxu0 %v798_v34 }
  0xd4   : > { %1551 = shalt.err (!%p1548_p5)
}
  0xd5   : > { %s1552_s17 = scalar_lea.hbm %s2130_s1, 4096  ;;  %s1556_s21 = scalar_lea.hbm %s2244_s8, 8192 }
  0xd6   : > { %p1553_p7 = scmp.ne.s32.totalorder %s2130_s1, %s1552_s17  ;;  %p1557_p12 = scmp.lt.u32.totalorder %s2130_s1, %s2244_s8 }
  0xd7   : > { %p1558_p8 = scmp.lt.u32.totalorder %s1556_s21, %s1552_s17  ;;  %p1560_p0 = scmp.lt.u32.totalorder %s1552_s17, %s2130_s1 }
  0xd8   : > { %p1554_p11 = pnand %p1553_p7, %p2277_p2 }
  0xd9   : > { %p1559_p13 = por %p1558_p8, %p1557_p12 }
  0xda   : > { %p1555_p1 = pneg %p1554_p11 }
  0xdb   : > { %p1561_p6 = por %p1560_p0, %p1559_p13 }
  0xdd   : > { %p1562_p10 = pnand %p1561_p6, %p1555_p1 }
  0xdf   : > { %1565 = shalt.err (!%p1562_p10)
}
  0xe0   : > { %s1698_s28 = smov 256   ;;  %s1699_s24 = smov 16   ;;  %vm933_vm0 = vcmp.lt.s32.totalorder %v917_v35, 256 }
  0xe1   : > { %1332 = dma.vmem_to_hbm [thread:$0]  (%p2277_p2), %s2133_s30, 4096, %s2130_s1, %s2135_s29, %s1698_s28, %s1698_s28, %s1699_s24  }
  0xe2   : > { %s551_s22 = scalar_lea.vmem [#allocation14], %s1270_s25  ;;  %s1286_s15 = sshll.u32 %s1680_s12, 5 }
  0xe3   : > { %935 = vst.msk [vmem:[%s551_s22] sm:$0x3] %vm933_vm0, %v913_v41  ;;  %s1000_s16 = sshll.u32 %s551_s22, 4  ;;  %s998_s7 = scalar_lea.hbm %s2245_s9, %s1286_s15  ;;  %s1001_s16 = int_to_ptr.vmem [resolvable:$true] %s1000_s16 }
  0xe4   : > { %s1566_s23 = scalar_lea.vmem %s1001_s16, 32  ;;  %s1700_s21 = smov [#allocation14]  }
  0xe5   : > { %p1567_p3 = scmp.ne.s32.totalorder %s1001_s16, %s1566_s23  ;;  %s1570_s0 = sshll.u32 %s1700_s21, 4  ;;  %s1571_s0 = int_to_ptr.vmem [resolvable:$false] %s1570_s0 }
  0xe6   : > { %s1572_s1 = scalar_lea.vmem %s1571_s0, 64  ;;  %p1573_p5 = scmp.lt.s32.totalorder %s1001_s16, %s1571_s0 }
  0xe7   : > { %p1568_p4 = pnand %p1567_p3, %p2277_p2  ;;  %p1574_p7 = scmp.lt.s32.totalorder %s1572_s1, %s1566_s23 }
  0xe9   : > { %p1569_p9 = pneg %p1568_p4  ;;  %p1575_p11 = por %p1574_p7, %p1573_p5 }
  0xeb   : > { %p1576_p1 = pnand %p1575_p11, %p1569_p9 }
  0xed   : > { %1579 = shalt.err (!%p1576_p1)
}
  0xee   : > { %s1580_s25 = scalar_lea.hbm %s998_s7, 32  ;;  %s1584_s28 = scalar_lea.hbm %s2245_s9, 64 }
  0xef   : > { %p1581_p12 = scmp.ne.s32.totalorder %s998_s7, %s1580_s25  ;;  %p1585_p0 = scmp.lt.u32.totalorder %s998_s7, %s2245_s9 }
  0xf0   : > { %p1586_p6 = scmp.lt.u32.totalorder %s1584_s28, %s1580_s25  ;;  %p1588_p3 = scmp.lt.u32.totalorder %s1580_s25, %s998_s7 }
  0xf1   : > { %p1582_p8 = pnand %p1581_p12, %p2277_p2 }
  0xf2   : > { %p1587_p10 = por %p1586_p6, %p1585_p0 }
  0xf3   : > { %p1583_p13 = pneg %p1582_p8 }
  0xf4   : > { %p1589_p4 = por %p1588_p3, %p1587_p10 }
  0xf6   : > { %p1590_p9 = pnand %p1589_p4, %p1583_p13 }
  0xf8   : > { %1593 = shalt.err (!%p1590_p9)
}
  0xf9   : > { %1333 = dma.vmem_to_hbm [thread:$0]  (%p2277_p2), %s1001_s16, 32, %s998_s7, %s2135_s29  }
  0xfa   : > { %s1268_s15 = sshll.u32 %s1985_s27, 4  ;;  %s1284_s2 = sshll.u32 %s1680_s12, 8 }
  0xfb   : > { %s537_s17 = scalar_lea.vmem [#allocation11], %s1268_s15  ;;  %s2278_s1 = sld [smem:[#allocation25_spill]] }
  0xfc   : > { %s963_s23 = sshll.u32 %s537_s17, 4  ;;  %s937_s12 = scalar_lea.sflag [#allocation5], %s1985_s27  ;;  %s2187_s23 = int_to_ptr.vmem [resolvable:$true] %s963_s23 }
  0xfd   : > { %s1594_s29 = scalar_lea.vmem %s2187_s23, 256  ;;  %s1701_s16 = smov [#allocation11]  }
  0xfe   : > { %p1595_p5 = scmp.ne.s32.totalorder %s2187_s23, %s1594_s29  ;;  %s1598_s7 = sshll.u32 %s1701_s16, 4  ;;  %s1599_s7 = int_to_ptr.vmem [resolvable:$false] %s1598_s7 }
  0xff   : > { %s1600_s30 = scalar_lea.vmem %s1599_s7, 512  ;;  %p1601_p1 = scmp.lt.s32.totalorder %s2187_s23, %s1599_s7 }
 0x100   : > { %p1596_p7 = pnand %p1595_p5, %p2277_p2  ;;  %p1602_p12 = scmp.lt.s32.totalorder %s1600_s30, %s1594_s29 }
 0x101   : > { %s2185_s25 = scalar_lea.hbm %s2278_s1, %s1284_s2 }
 0x102   : > { %p1597_p11 = pneg %p1596_p7  ;;  %p1603_p8 = por %p1602_p12, %p1601_p1 }
 0x104   : > { %p1604_p13 = pnand %p1603_p8, %p1597_p11 }
 0x1a6   : > { %v865_v46 = vpop.f32.mrb[0].mxu0 }
 0x1a7   : > { %v927_v47 = vadd.f32 %v2120_v44, %v865_v46  ;;  %v867_v48 = vpop.f32.mrb[1].mxu0 }
 0x1a8   : > { %v928_v49 = vadd.f32 %v2122_v45, %v867_v48 }
 0x1a9   : > { %929 = vst [vmem:[%s537_s17] sm:$0xff] %v927_v47 }
 0x1aa   : > { %930 = vst [vmem:[%s537_s17 + $0x8] sm:$0xff] %v928_v49 }
 0x1ab   : > { %1607 = shalt.err (!%p1604_p13)
}
 0x1ac   : > { %s1608_s27 = scalar_lea.hbm %s2185_s25, 256  ;;  %s1612_s24 = scalar_lea.hbm %s2278_s1, 512 }
 0x1ad   : > { %p1609_p0 = scmp.ne.s32.totalorder %s2185_s25, %s1608_s27  ;;  %p1613_p3 = scmp.lt.u32.totalorder %s2185_s25, %s2278_s1 }
 0x1ae   : > { %p1614_p4 = scmp.lt.u32.totalorder %s1612_s24, %s1608_s27  ;;  %p1616_p5 = scmp.lt.u32.totalorder %s1608_s27, %s2185_s25 }
 0x1af   : > { %p1610_p6 = pnand %p1609_p0, %p2277_p2 }
 0x1b0   : > { %p1615_p9 = por %p1614_p4, %p1613_p3 }
 0x1b1   : > { %p1611_p10 = pneg %p1610_p6 }
 0x1b2   : > { %p1617_p7 = por %p1616_p5, %p1615_p9 }
 0x1b4   : > { %p1618_p11 = pnand %p1617_p7, %p1611_p10 }
 0x1b6   : > { %1621 = shalt.err (!%p1618_p11)
}
 0x1b7   : > { %1331 = dma.vmem_to_hbm [thread:$0]  (%p2277_p2), %s2187_s23, 256, %s2185_s25, %s937_s12  }
 0x1b8 PF: > { %s2279_s2 = sld [smem:[#allocation20_spill]]  ;;  %s2280_s17 = sld [smem:[#allocation21_spill]] }
 0x1b9   : > { %p2282_p12 = scmp.ge.s32.totalorder %s1688_s14, 2 }
 0x1be   : > { %s1012_s21 = sand.u32 1, %s2279_s2   ;;  %p2281_p1 = scmp.ne.s32.totalorder %s2280_s17, 0 }
 0x1bf   : > { %s1013_s0 = scalar_lea.sflag [#allocation5], %s1012_s21 }
 0x1c0   : > { %p1352_p8 = pnand %p2282_p12, %p2281_p1 }
 0x1c2   : > { %1659 = dma.done.wait (!%p1352_p8), %s1013_s0, 256  }
 0x1c3   : > { %1661 = vsyncadd (!%p1352_p8), %s1013_s0, 4294967040  ;;  %s2283_s29 = sadd.s32 4294967294, %s1688_s14  }
 0x1c4   : > { %s1021_s16 = sand.u32 1, %s2283_s29  }
 0x1c5   : > { %s1022_s7 = scalar_lea.sflag [#allocation13], %s1021_s16 }
 0x1c6   : > { %1663 = dma.done.wait (!%p1352_p8), %s1022_s7, 4128  }
 0x1c7   : > { %1665 = vsyncadd (!%p1352_p8), %s1022_s7, 4294963168  ;;  %s33_s14 = sadd.s32 1, %s1688_s14   ;;  %s2284_s30 = smov %s1672_s10 }
 0x1c8   : > { %p30_p2 = scmp.ge.s32.totalorder %s33_s14, 4   ;;  %s2285_s10 = smov %s1676_s11 }
 0x1c9   : > { %s2286_s11 = smov %s1901_s20  ;;  %s2287_s12 = smov %s1684_s13 }
 0x1ca   : > { %s2288_s13 = smov %s2290_s18  ;;  %32 = sbr.rel (!%p30_p2) target bundleno = 16 (0x10), region = 165 }
 0x1d1   :  { %1036 = vsyncpa [#allocation4], 1 }
 0x1d2   :  { %1038 = vsyncpa [#allocation4 + $0x1], 1 }
 0x1d3   :  { %1039 = vsyncpa [#allocation7], 1 }
 0x1d4   :  { %1040 = vsyncpa [#allocation10], 1 }
 0x1d5   :  { %1042 = vsyncpa [#allocation10 + $0x1], 1 }
 0x1d6   :  { %1043 = vsyncpa [#allocation5], 1 }
 0x1d7   :  { %1045 = vsyncpa [#allocation5 + $0x1], 1 }
 0x1d8   :  { %1046 = vsyncpa [#allocation13], 1 }
 0x1d9   :  { %1048 = vsyncpa [#allocation13 + $0x1], 1 }

</bundles_post_ra>
